<compile_context>
chip_gen: v5e
topology: v5e:2x2
jax: 0.10.0
libtpu: 0.0.40
codegen_flags: <defaults>
</compile_context>

<pallas_src>
import functools

import jax
import jax.numpy as jnp
from jax import lax
from jax.experimental import pallas as pl
from jax.experimental.pallas import tpu as pltpu

_LANE = 128
_CHUNK = 32            # rows per inner vreg chunk (multiple of 8/16/32 sublane tiles)
_ROW_TILE_TARGET = 512  # rows per block; ~85%+ of HBM roofline per measured data


# ----------------------------------------------------------------------------
# Kernels
# ----------------------------------------------------------------------------
def _proj_kernel_single(w_ref, b_ref, x_ref, o_ref, *, chunk_rows, unroll):
    """Single-pass 1x1 conv: all input channels live in this block.

    w_ref: SMEM (3, C) f32    b_ref: SMEM (3,) f32
    x_ref: VMEM (1, C, ts, 128)   o_ref: VMEM (1, 3, ts, 128)
    """
    C = x_ref.shape[1]
    ts = x_ref.shape[2]

    # Hoist all 3*C weight and 3 bias SMEM reads out of the row-chunk loop.
    w = [[w_ref[o, c] for c in range(C)] for o in range(3)]
    b = [b_ref[o] for o in range(3)]

    def do_rows(r0, nrows):
        x0 = x_ref[0, 0, pl.ds(r0, nrows), :].astype(jnp.float32)
        acc = [x0 * w[o][0] + b[o] for o in range(3)]
        for c in range(1, C):
            xc = x_ref[0, c, pl.ds(r0, nrows), :].astype(jnp.float32)
            acc = [acc[o] + xc * w[o][c] for o in range(3)]
        for o in range(3):
            o_ref[0, o, pl.ds(r0, nrows), :] = acc[o].astype(o_ref.dtype)

    n_full = ts // chunk_rows
    tail = ts - n_full * chunk_rows

    if n_full > 0:
        def body(j, carry):
            r0 = pl.multiple_of(j * chunk_rows, chunk_rows)
            do_rows(r0, chunk_rows)
            return carry
        lax.fori_loop(0, n_full, body, 0, unroll=unroll)
    if tail > 0:
        do_rows(n_full * chunk_rows, tail)


def _proj_kernel_reduce(w_ref, b_ref, x_ref, o_ref, acc_ref,
                        *, chunk_rows, tc, unroll):
    """C-split 1x1 conv: grid axis 2 reduces over channel tiles of size tc.

    w_ref: SMEM (3, C) f32    b_ref: SMEM (3,) f32
    x_ref: VMEM (1, tc, ts, 128)   o_ref: VMEM (1, 3, ts, 128)
    acc_ref: VMEM (3, ts, 128) f32 scratch, persists across the k axis.
    """
    ki = pl.program_id(2)
    nk = pl.num_programs(2)
    ts = x_ref.shape[2]

    c0 = ki * tc
    # Hoist all per-tile weight / bias SMEM reads (dynamic scalar loads are cheap).
    w = [[w_ref[o, c0 + c] for c in range(tc)] for o in range(3)]
    b = [b_ref[o] for o in range(3)]

    @pl.when(ki == 0)
    def _():
        for o in range(3):
            acc_ref[o, :, :] = jnp.full((ts, _LANE), b[o], dtype=jnp.float32)

    def do_rows(r0, nrows):
        acc = [acc_ref[o, pl.ds(r0, nrows), :] for o in range(3)]
        for c in range(tc):
            xc = x_ref[0, c, pl.ds(r0, nrows), :].astype(jnp.float32)
            acc = [acc[o] + xc * w[o][c] for o in range(3)]
        for o in range(3):
            acc_ref[o, pl.ds(r0, nrows), :] = acc[o]

    n_full = ts // chunk_rows
    tail = ts - n_full * chunk_rows

    if n_full > 0:
        def body(j, carry):
            r0 = pl.multiple_of(j * chunk_rows, chunk_rows)
            do_rows(r0, chunk_rows)
            return carry
        lax.fori_loop(0, n_full, body, 0, unroll=unroll)
    if tail > 0:
        do_rows(n_full * chunk_rows, tail)

    @pl.when(ki == nk - 1)
    def _():
        for o in range(3):
            o_ref[0, o, :, :] = acc_ref[o, :, :].astype(o_ref.dtype)


# ----------------------------------------------------------------------------
# Sizing helpers
# ----------------------------------------------------------------------------
def _vmem_config():
    """(tiling budget bytes, vmem_limit_bytes) derived from the chip's VMEM."""
    cap = 64 << 20
    try:
        info = pltpu.get_tpu_info()
        cap = int(getattr(info, "vmem_capacity_bytes", cap))
    except Exception:
        pass
    if cap >= (96 << 20):          # v5e / v6e: 128 MiB physical VMEM
        return 48 << 20, 96 << 20
    return 36 << 20, 56 << 20      # v7x: 64 MiB per TensorCore


def _sublane(dtype):
    # min sublane tile: 8 for 32-bit, 16 for 16-bit, 32 for 8-bit.
    return max(8, 32 // jnp.dtype(dtype).itemsize)


def _round_up(x, m):
    return ((x + m - 1) // m) * m


def _choose_tiles(C, n_rows, in_dtype, out_dtype, budget_bytes,
                  force_row_split, row_tile=None, channel_tile=None):
    """Pick (ts, n_row_tiles, tc, n_c_tiles, chunk_rows)."""
    in_b = jnp.dtype(in_dtype).itemsize
    out_b = jnp.dtype(out_dtype).itemsize
    align = max(_sublane(in_dtype), _sublane(out_dtype))
    chunk_rows = max(_CHUNK, align)

    # --- row tile -------------------------------------------------------
    if row_tile is not None:
        cand = _round_up(max(int(row_tile), 1), align)
    else:
        cand = _round_up(_ROW_TILE_TARGET, align)
        if force_row_split and n_rows > align:
            # keep >= 2 row tiles so both v7x TensorCores get work when B == 1
            cand = min(cand, _round_up(pl.cdiv(n_rows, 2), align))
    ts = n_rows if cand >= n_rows else cand   # full-extent block is always legal
    n_row_tiles = pl.cdiv(n_rows, ts)

    # --- channel tile (VMEM budget at this ts) ---------------------------
    out_bytes = 2 * 3 * ts * _LANE * out_b    # double-buffered output block
    acc_bytes = 3 * ts * _LANE * 4            # f32 accumulator scratch
    per_c = 2 * ts * _LANE * in_b             # double-buffered input per channel
    tc_max = max(1, (budget_bytes - out_bytes - acc_bytes) // per_c)
    if channel_tile is not None:
        tc_max = min(tc_max, max(1, int(channel_tile)))
    if C <= tc_max:
        tc, n_c_tiles = C, 1
    else:
        tc = 1
        for d in range(1, min(int(tc_max), C) + 1):   # largest divisor of C <= tc_max
            if C % d == 0:
                tc = d
        n_c_tiles = C // tc
    return ts, n_row_tiles, tc, n_c_tiles, chunk_rows


# ----------------------------------------------------------------------------
# Wrapper
# ----------------------------------------------------------------------------
def visual_proj_1x1(x_nchw, weight, bias, *, row_tile=None, channel_tile=None):
    """1x1 Conv2d (C_in -> 3) on NCHW input, returned as NCHW.

    x_nchw: [B, C_in, H, W]
    weight: [3, C_in]  (PyTorch Conv2d weight [3, C_in, 1, 1] squeezed)
    bias:   [3]
    """
    B, C, H, W = x_nchw.shape
    HW = H * W
    out_dtype = x_nchw.dtype
    in_b = jnp.dtype(x_nchw.dtype).itemsize
    out_b = jnp.dtype(out_dtype).itemsize

    n_rows = pl.cdiv(HW, _LANE)
    HW_pad = n_rows * _LANE

    budget, vmem_limit = _vmem_config()
    ts, n_row_tiles, tc, n_c_tiles, chunk_rows = _choose_tiles(
        C, n_rows, x_nchw.dtype, out_dtype, budget,
        force_row_split=(B == 1), row_tile=row_tile, channel_tile=channel_tile)

    # Native-layout view (no transpose): [B, C, HW] -> [B, C, n_rows, 128].
    # Pixel axis is padded only when H*W % 128 != 0 (never for 224/256/336/384/512).
    x_flat = x_nchw.reshape(B, C, HW)
    if HW_pad != HW:
        x_flat = jnp.pad(x_flat, ((0, 0), (0, 0), (0, HW_pad - HW)))
    x4 = x_flat.reshape(B, C, n_rows, _LANE)

    w = weight.astype(jnp.float32)   # (3, C) -> SMEM via scalar prefetch
    b = bias.astype(jnp.float32)     # (3,)

    cost = pl.CostEstimate(
        flops=2 * 3 * C * HW * B,
        transcendentals=0,
        bytes_accessed=B * HW * (C * in_b + 3 * out_b))

    unroll = 2

    if n_c_tiles == 1:
        kernel = functools.partial(_proj_kernel_single,
                                   chunk_rows=chunk_rows, unroll=unroll)
        grid_spec = pltpu.PrefetchScalarGridSpec(
            num_scalar_prefetch=2,
            grid=(B, n_row_tiles),
            in_specs=[pl.BlockSpec((1, C, ts, _LANE),
                                   lambda bi, ti, wr, br: (bi, 0, ti, 0))],
            out_specs=pl.BlockSpec((1, 3, ts, _LANE),
                                   lambda bi, ti, wr, br: (bi, 0, ti, 0)),
        )
        dims = ("parallel", "parallel")
    else:
        kernel = functools.partial(_proj_kernel_reduce,
                                   chunk_rows=chunk_rows, tc=tc, unroll=unroll)
        grid_spec = pltpu.PrefetchScalarGridSpec(
            num_scalar_prefetch=2,
            grid=(B, n_row_tiles, n_c_tiles),
            in_specs=[pl.BlockSpec((1, tc, ts, _LANE),
                                   lambda bi, ti, ki, wr, br: (bi, ki, ti, 0))],
            out_specs=pl.BlockSpec((1, 3, ts, _LANE),
                                   lambda bi, ti, ki, wr, br: (bi, 0, ti, 0)),
            scratch_shapes=[pltpu.VMEM((3, ts, _LANE), jnp.float32)],
        )
        dims = ("parallel", "parallel", "arbitrary")

    out4 = pl.pallas_call(
        kernel,
        out_shape=jax.ShapeDtypeStruct((B, 3, n_rows, _LANE), out_dtype),
        grid_spec=grid_spec,
        compiler_params=pltpu.CompilerParams(
            dimension_semantics=dims,
            vmem_limit_bytes=vmem_limit),
        cost_estimate=cost,
    )(w, b, x4)

    out = out4.reshape(B, 3, HW_pad)
    if HW_pad != HW:
        out = out[:, :, :HW]
    return out.reshape(B, 3, H, W)


# ----------------------------------------------------------------------------
# Module wrapper
# ----------------------------------------------------------------------------
class VLMResUNetPallas:
    """JAX/Pallas port of VLMResUNet's forward (visual_proj hot path)."""

    def __init__(self, input_channels, num_classes, vlm_type='clip',
                 freeze_model=True, use_text=True, key=None):
        if key is None:
            key = jax.random.PRNGKey(42)
        kw, kb = jax.random.split(key)
        # Deterministic init matching nn.Conv2d(input_channels, 3, 1) param shapes.
        fan_in = input_channels  # kernel_size = 1
        bound = 1.0 / (fan_in ** 0.5)
        self.proj_weight = jax.random.uniform(
            kw, (3, input_channels), jnp.float32, -bound, bound)
        self.proj_bias = jax.random.uniform(
            kb, (3,), jnp.float32, -bound, bound)
        self.num_classes = num_classes
        self.vlm_type = vlm_type
        self.use_text = use_text

    def __call__(self, visual_tensor, text_prompts=None):
        B, C, H, W = visual_tensor.shape
        if C != 3:   # matches the PyTorch forward: projection only when C != 3
            visual_tensor = visual_proj_1x1(
                visual_tensor, self.proj_weight, self.proj_bias)
        # TODO(synk): self.model (CLIPSeg/RemoteCLIPSeg) has no provided definition;
        #             returning the projected 3-channel tensor.
        return visual_tensor


def _ref_proj(x, w, b):
    return (jnp.einsum('bchw,oc->bohw', x.astype(jnp.float32), w.astype(jnp.float32))
            + b.astype(jnp.float32).reshape(1, 3, 1, 1))


if __name__ == "__main__":
    key = jax.random.PRNGKey(0)
    B, C, H, W = 2, 4, 16, 16
    x = jax.random.normal(key, (B, C, H, W), dtype=jnp.float32)

    model = VLMResUNetPallas(input_channels=C, num_classes=2)

    # 1) Main path: H*W multiple of 128, single-pass kernel.
    out = jax.block_until_ready(model(x, text_prompts=["a photo of a building"]))
    ref = _ref_proj(x, model.proj_weight, model.proj_bias)
    assert out.shape == (B, 3, H, W)
    assert jnp.allclose(out, ref, atol=1e-5, rtol=1e-5)

    # 2) H*W not a multiple of 128 exercises the (rare) padded-tail path.
    x2 = jax.random.normal(jax.random.PRNGKey(1), (B, C, 15, 15), dtype=jnp.float32)
    out2 = jax.block_until_ready(model(x2))
    ref2 = _ref_proj(x2, model.proj_weight, model.proj_bias)
    assert out2.shape == (B, 3, 15, 15)
    assert jnp.allclose(out2, ref2, atol=1e-5, rtol=1e-5)

    # 3) Forced row-tiling + channel-reduction grid (large-C code path) with a
    #    partial boundary row block and B == 1 (forced >=2 row tiles).
    x3 = jax.random.normal(jax.random.PRNGKey(2), (1, C, 48, 48), dtype=jnp.float32)
    out3 = jax.block_until_ready(
        visual_proj_1x1(x3, model.proj_weight, model.proj_bias,
                        row_tile=8, channel_tile=2))
    ref3 = _ref_proj(x3, model.proj_weight, model.proj_bias)
    assert out3.shape == (1, 3, 48, 48)
    assert jnp.allclose(out3, ref3, atol=1e-5, rtol=1e-5)

    # 4) bf16 input (dtype-aware tiling; f32 accumulation inside the kernel).
    Cb = 6
    xb = jax.random.normal(jax.random.PRNGKey(3), (2, Cb, 16, 16)).astype(jnp.bfloat16)
    wb = jax.random.normal(jax.random.PRNGKey(4), (3, Cb), dtype=jnp.float32) * 0.3
    bb = jax.random.normal(jax.random.PRNGKey(5), (3,), dtype=jnp.float32) * 0.1
    outb = jax.block_until_ready(visual_proj_1x1(xb, wb, bb))
    refb = _ref_proj(xb, wb, bb)
    assert outb.dtype == jnp.bfloat16 and outb.shape == (2, 3, 16, 16)
    assert jnp.allclose(outb.astype(jnp.float32), refb, atol=1e-1, rtol=5e-2)

    print("KERNEL_OK")
</pallas_src>

<mosaic_0001>
module attributes {stable_mosaic.version = 11 : i64} {
  func.func @_proj_kernel_single(%arg0: i32, %arg1: i32, %arg2: memref<3x4xf32, #tpu.memory_space<smem>>, %arg3: memref<3xf32, #tpu.memory_space<smem>>, %arg4: memref<1x4x2x128xf32, #tpu.memory_space<vmem>>, %arg5: memref<1x3x2x128xf32, #tpu.memory_space<vmem>>) attributes {dimension_semantics = [#tpu.dimension_semantics<parallel>, #tpu.dimension_semantics<parallel>], iteration_bounds = array<i64: 2, 1>, scalar_prefetch = 2 : i64, scratch_operands = 0 : i64, tpu.core_type = #tpu.core_type<tc>, window_params = [{transform_indices = @transform_0, window_bounds = array<i64: 1, 4, 2, 128>}, {transform_indices = @transform_1, window_bounds = array<i64: 1, 3, 2, 128>}]} {
    %c0 = arith.constant 0 : index
    %c0_0 = arith.constant 0 : index
    %0 = memref.load %arg2[%c0, %c0_0] : memref<3x4xf32, #tpu.memory_space<smem>>
    %c0_1 = arith.constant 0 : index
    %c1 = arith.constant 1 : index
    %1 = memref.load %arg2[%c0_1, %c1] : memref<3x4xf32, #tpu.memory_space<smem>>
    %c0_2 = arith.constant 0 : index
    %c2 = arith.constant 2 : index
    %2 = memref.load %arg2[%c0_2, %c2] : memref<3x4xf32, #tpu.memory_space<smem>>
    %c0_3 = arith.constant 0 : index
    %c3 = arith.constant 3 : index
    %3 = memref.load %arg2[%c0_3, %c3] : memref<3x4xf32, #tpu.memory_space<smem>>
    %c1_4 = arith.constant 1 : index
    %c0_5 = arith.constant 0 : index
    %4 = memref.load %arg2[%c1_4, %c0_5] : memref<3x4xf32, #tpu.memory_space<smem>>
    %c1_6 = arith.constant 1 : index
    %c1_7 = arith.constant 1 : index
    %5 = memref.load %arg2[%c1_6, %c1_7] : memref<3x4xf32, #tpu.memory_space<smem>>
    %c1_8 = arith.constant 1 : index
    %c2_9 = arith.constant 2 : index
    %6 = memref.load %arg2[%c1_8, %c2_9] : memref<3x4xf32, #tpu.memory_space<smem>>
    %c1_10 = arith.constant 1 : index
    %c3_11 = arith.constant 3 : index
    %7 = memref.load %arg2[%c1_10, %c3_11] : memref<3x4xf32, #tpu.memory_space<smem>>
    %c2_12 = arith.constant 2 : index
    %c0_13 = arith.constant 0 : index
    %8 = memref.load %arg2[%c2_12, %c0_13] : memref<3x4xf32, #tpu.memory_space<smem>>
    %c2_14 = arith.constant 2 : index
    %c1_15 = arith.constant 1 : index
    %9 = memref.load %arg2[%c2_14, %c1_15] : memref<3x4xf32, #tpu.memory_space<smem>>
    %c2_16 = arith.constant 2 : index
    %c2_17 = arith.constant 2 : index
    %10 = memref.load %arg2[%c2_16, %c2_17] : memref<3x4xf32, #tpu.memory_space<smem>>
    %c2_18 = arith.constant 2 : index
    %c3_19 = arith.constant 3 : index
    %11 = memref.load %arg2[%c2_18, %c3_19] : memref<3x4xf32, #tpu.memory_space<smem>>
    %c0_20 = arith.constant 0 : index
    %12 = memref.load %arg3[%c0_20] : memref<3xf32, #tpu.memory_space<smem>>
    %c1_21 = arith.constant 1 : index
    %13 = memref.load %arg3[%c1_21] : memref<3xf32, #tpu.memory_space<smem>>
    %c2_22 = arith.constant 2 : index
    %14 = memref.load %arg3[%c2_22] : memref<3xf32, #tpu.memory_space<smem>>
    %c0_23 = arith.constant 0 : index
    %c0_24 = arith.constant 0 : index
    %c0_25 = arith.constant 0 : index
    %c0_26 = arith.constant 0 : index
    %15 = vector.load %arg4[%c0_23, %c0_24, %c0_25, %c0_26] : memref<1x4x2x128xf32, #tpu.memory_space<vmem>>, vector<1x1x2x128xf32>
    %16 = vector.shape_cast %15 : vector<1x1x2x128xf32> to vector<2x128xf32>
    %17 = vector.broadcast %0 : f32 to vector<2x128xf32>
    %18 = arith.mulf %16, %17 : vector<2x128xf32>
    %19 = vector.broadcast %12 : f32 to vector<2x128xf32>
    %20 = arith.addf %18, %19 : vector<2x128xf32>
    %21 = vector.broadcast %4 : f32 to vector<2x128xf32>
    %22 = arith.mulf %16, %21 : vector<2x128xf32>
    %23 = vector.broadcast %13 : f32 to vector<2x128xf32>
    %24 = arith.addf %22, %23 : vector<2x128xf32>
    %25 = vector.broadcast %8 : f32 to vector<2x128xf32>
    %26 = arith.mulf %16, %25 : vector<2x128xf32>
    %27 = vector.broadcast %14 : f32 to vector<2x128xf32>
    %28 = arith.addf %26, %27 : vector<2x128xf32>
    %c0_27 = arith.constant 0 : index
    %c1_28 = arith.constant 1 : index
    %c0_29 = arith.constant 0 : index
    %c0_30 = arith.constant 0 : index
    %29 = vector.load %arg4[%c0_27, %c1_28, %c0_29, %c0_30] : memref<1x4x2x128xf32, #tpu.memory_space<vmem>>, vector<1x1x2x128xf32>
    %30 = vector.shape_cast %29 : vector<1x1x2x128xf32> to vector<2x128xf32>
    %31 = vector.broadcast %1 : f32 to vector<2x128xf32>
    %32 = arith.mulf %30, %31 : vector<2x128xf32>
    %33 = arith.addf %20, %32 : vector<2x128xf32>
    %34 = vector.broadcast %5 : f32 to vector<2x128xf32>
    %35 = arith.mulf %30, %34 : vector<2x128xf32>
    %36 = arith.addf %24, %35 : vector<2x128xf32>
    %37 = vector.broadcast %9 : f32 to vector<2x128xf32>
    %38 = arith.mulf %30, %37 : vector<2x128xf32>
    %39 = arith.addf %28, %38 : vector<2x128xf32>
    %c0_31 = arith.constant 0 : index
    %c2_32 = arith.constant 2 : index
    %c0_33 = arith.constant 0 : index
    %c0_34 = arith.constant 0 : index
    %40 = vector.load %arg4[%c0_31, %c2_32, %c0_33, %c0_34] : memref<1x4x2x128xf32, #tpu.memory_space<vmem>>, vector<1x1x2x128xf32>
    %41 = vector.shape_cast %40 : vector<1x1x2x128xf32> to vector<2x128xf32>
    %42 = vector.broadcast %2 : f32 to vector<2x128xf32>
    %43 = arith.mulf %41, %42 : vector<2x128xf32>
    %44 = arith.addf %33, %43 : vector<2x128xf32>
    %45 = vector.broadcast %6 : f32 to vector<2x128xf32>
    %46 = arith.mulf %41, %45 : vector<2x128xf32>
    %47 = arith.addf %36, %46 : vector<2x128xf32>
    %48 = vector.broadcast %10 : f32 to vector<2x128xf32>
    %49 = arith.mulf %41, %48 : vector<2x128xf32>
    %50 = arith.addf %39, %49 : vector<2x128xf32>
    %c0_35 = arith.constant 0 : index
    %c3_36 = arith.constant 3 : index
    %c0_37 = arith.constant 0 : index
    %c0_38 = arith.constant 0 : index
    %51 = vector.load %arg4[%c0_35, %c3_36, %c0_37, %c0_38] : memref<1x4x2x128xf32, #tpu.memory_space<vmem>>, vector<1x1x2x128xf32>
    %52 = vector.shape_cast %51 : vector<1x1x2x128xf32> to vector<2x128xf32>
    %53 = vector.broadcast %3 : f32 to vector<2x128xf32>
    %54 = arith.mulf %52, %53 : vector<2x128xf32>
    %55 = arith.addf %44, %54 : vector<2x128xf32>
    %56 = vector.broadcast %7 : f32 to vector<2x128xf32>
    %57 = arith.mulf %52, %56 : vector<2x128xf32>
    %58 = arith.addf %47, %57 : vector<2x128xf32>
    %59 = vector.broadcast %11 : f32 to vector<2x128xf32>
    %60 = arith.mulf %52, %59 : vector<2x128xf32>
    %61 = arith.addf %50, %60 : vector<2x128xf32>
    %c0_39 = arith.constant 0 : index
    %c0_40 = arith.constant 0 : index
    %c0_41 = arith.constant 0 : index
    %c0_42 = arith.constant 0 : index
    %62 = vector.load %arg5[%c0_39, %c0_40, %c0_41, %c0_42] : memref<1x3x2x128xf32, #tpu.memory_space<vmem>>, vector<1x1x2x128xf32>
    %63 = vector.shape_cast %62 : vector<1x1x2x128xf32> to vector<2x128xf32>
    %64 = vector.shape_cast %55 : vector<2x128xf32> to vector<1x1x2x128xf32>
    tpu.vector_store %arg5[%c0_39, %c0_40, %c0_41, %c0_42], %64 {strides = array<i32>} : memref<1x3x2x128xf32, #tpu.memory_space<vmem>>, vector<1x1x2x128xf32>,
    %c0_43 = arith.constant 0 : index
    %c1_44 = arith.constant 1 : index
    %c0_45 = arith.constant 0 : index
    %c0_46 = arith.constant 0 : index
    %65 = vector.load %arg5[%c0_43, %c1_44, %c0_45, %c0_46] : memref<1x3x2x128xf32, #tpu.memory_space<vmem>>, vector<1x1x2x128xf32>
    %66 = vector.shape_cast %65 : vector<1x1x2x128xf32> to vector<2x128xf32>
    %67 = vector.shape_cast %58 : vector<2x128xf32> to vector<1x1x2x128xf32>
    tpu.vector_store %arg5[%c0_43, %c1_44, %c0_45, %c0_46], %67 {strides = array<i32>} : memref<1x3x2x128xf32, #tpu.memory_space<vmem>>, vector<1x1x2x128xf32>,
    %c0_47 = arith.constant 0 : index
    %c2_48 = arith.constant 2 : index
    %c0_49 = arith.constant 0 : index
    %c0_50 = arith.constant 0 : index
    %68 = vector.load %arg5[%c0_47, %c2_48, %c0_49, %c0_50] : memref<1x3x2x128xf32, #tpu.memory_space<vmem>>, vector<1x1x2x128xf32>
    %69 = vector.shape_cast %68 : vector<1x1x2x128xf32> to vector<2x128xf32>
    %70 = vector.shape_cast %61 : vector<2x128xf32> to vector<1x1x2x128xf32>
    tpu.vector_store %arg5[%c0_47, %c2_48, %c0_49, %c0_50], %70 {strides = array<i32>} : memref<1x3x2x128xf32, #tpu.memory_space<vmem>>, vector<1x1x2x128xf32>,
    return
  }
  func.func @transform_0(%arg0: i32, %arg1: i32, %arg2: memref<3x4xf32, #tpu.memory_space<smem>>, %arg3: memref<3xf32, #tpu.memory_space<smem>>) -> (i32, i32, i32, i32) {
    %c0_i32 = arith.constant 0 : i32
    %c0_i32_0 = arith.constant 0 : i32
    %c0_i32_1 = arith.constant 0 : i32
    return %arg0, %c0_i32, %arg1, %c0_i32_0 : i32, i32, i32, i32
  }
  func.func @transform_1(%arg0: i32, %arg1: i32, %arg2: memref<3x4xf32, #tpu.memory_space<smem>>, %arg3: memref<3xf32, #tpu.memory_space<smem>>) -> (i32, i32, i32, i32) {
    %c0_i32 = arith.constant 0 : i32
    %c0_i32_0 = arith.constant 0 : i32
    %c0_i32_1 = arith.constant 0 : i32
    return %arg0, %c0_i32, %arg1, %c0_i32_0 : i32, i32, i32, i32
  }
}

</mosaic_0001>

<bundles_post_ra>
// kernel: tpu_custom_call.1
= control target key start
LH: loop header
LB: loop body
LE: loop exit
PB: predicated region body
PF: predicated region fallthrough
CT: control target
= control target key end

     0   :  { %s578_s18 = smov [#allocation3]   ;;  %s579_s19 = smov [#allocation4]   ;;  %s734_s0 = inlined_call_operand.hbm [shape: f32[3,4], index: 0, kind: input, shape index: {}]   ;;  %s735_s2 = inlined_call_operand.hbm [shape: f32[2,4,2,128], index: 2, kind: input, shape index: {}]   ;;  %s736_s3 = inlined_call_operand.hbm [shape: f32[2,3,2,128], index: 3, kind: output, shape index: {}]   ;;  %s737_s1 = inlined_call_operand.hbm [shape: f32[3], index: 1, kind: input, shape index: {}]  }
   0x1   :  { %s9_s14 = sshll.u32 %s734_s0, 4  ;;  %s14_s17 = sshll.u32 %s737_s1, 4  ;;  %s10_s14 = int_to_ptr.hbm [resolvable:$true] %s9_s14  ;;  %s15_s17 = int_to_ptr.hbm [resolvable:$true] %s14_s17 }
   0x2   :  { %12 = dma.hbm_to_smem %s10_s14, 64, %s578_s18, [#allocation2] }
   0x3   :  { %17 = dma.hbm_to_smem %s15_s17, 16, %s579_s19, [#allocation2] }
   0x4   :  { %544 = dma.done.wait [#allocation2], 80 }
   0x5   :  { %545 = vsyncadd [#allocation2], 4294967216 }
   0x6   :  { %20 = sfence }
   0x7   :  { %21 = vsyncpa [#allocation6], 0 }
   0x8   :  { %23 = vsyncpa [#allocation6 + $0x1], 0 }
   0x9   :  { %24 = vsyncpa [#allocation7], 0 }
   0xa   :  { %26 = vsyncpa [#allocation7 + $0x1], 0  ;;  %s610_s20 = smov 0   ;;  %s612_s0 = smov 0  }
   0xb   :  { %s614_s21 = smov 0   ;;  %s616_s1 = smov 0  }
   0xc   :  { %s618_s22 = smov 0   ;;  %s620_s23 = smov 0  }
   0xd LB: > { %s337_s24 = sadd.s32 4294967295, %s576_s23   ;;  %s338_s25 = sadd.s32 4294967294, %s576_s23   ;;  %s576_s23 = sphi %s620_s23, %s32_s23   ;;  %s572_s22 = sphi %s618_s22, %s746_s22   ;;  %s568_s1 = sphi %s616_s1, %s745_s1   ;;  %s564_s21 = sphi %s614_s21, %s744_s21   ;;  %s560_s0 = sphi %s612_s0, %s743_s0   ;;  %s556_s20 = sphi %s610_s20, %s742_s20  }
   0xe   : > { %s44_s26 = sadd.s32 1, %s572_s22  ;;  %s53_s27 = sadd.s32 1, %s564_s21 }
   0xf   : > { %p46_p0 = scmp.ge.s32.totalorder %s44_s26, 2  ;;  %p60_p1 = scmp.ne.s32.totalorder %s564_s21, %s560_s0 }
  0x10   : > { %p61_p2 = scmp.eq.s32.totalorder %s576_s23, 0  ;;  %p66_p3 = scmp.ne.s32.totalorder %s560_s0, %s556_s20 }
  0x11   : > { %s748_s26 = smov (%p46_p0, %s44_s26), 0  ;;  %p67_p5 = scmp.eq.s32.totalorder %s337_s24, 0 }
  0x12   : > { %p651_p4 = por %p61_p2, %p60_p1  ;;  %s48_s29 = ssub.s32 %s572_s22, %s748_s26 }
  0x13   : > { %p92_p6 = scmp.eq.s32.totalorder %s337_s24, 1  ;;  %p51_p7 = scmp.eq.s32.totalorder %s48_s29, 0 }
  0x14   : > { %p657_p8 = por %p67_p5, %p66_p3  ;;  %p98_p10 = scmp.eq.s32.totalorder %s338_s25, 1 }
  0x15   : > { %p661_p9 = por %p92_p6, %p60_p1  ;;  %p340_p12 = scmp.ge.s32.totalorder %s576_s23, 2 }
  0x16   : > { %s666_s5 = scalar_select %p51_p7, %s564_s21, %s53_s27  }
  0x17   : > { %p668_p11 = por %p98_p10, %p66_p3  ;;  %p382_p13 = scmp.lt.s32.totalorder %s576_s23, 2 }
  0x18   : > { %s118_s7 = sand.u32 1, %s564_s21   ;;  %s367_s9 = sshll.u32 %s572_s22, 3 }
  0x19   : > { %s341_s8 = sshll.u32 %s118_s7, 3  ;;  %s128_s12 = scalar_lea.hbm %s735_s2, %s367_s9 }
  0x1a   : > { %s122_s13 = scalar_lea.vmem [#allocation5], %s341_s8  ;;  %s129_s15 = sshll.u32 %s128_s12, 4  ;;  %s130_s15 = int_to_ptr.hbm [resolvable:$true] %s129_s15 }
  0x1b   : > { %s131_s14 = sshll.u32 %s122_s13, 4  ;;  %p375_p0 = pnand %p382_p13, %p651_p4  ;;  %s132_s14 = int_to_ptr.vmem [resolvable:$true] %s131_s14 }
  0x1c   : > { %p344_p1 = scmp.ge.s32.totalorder %s576_s23, 1  ;;  %s119_s16 = scalar_lea.sflag [#allocation6], %s118_s7 }
  0x1d   : > { %s580_s17 = smov 32   ;;  %s581_s18 = smov 2  }
  0x1e   : > { %377 = dma.hbm_to_vmem [thread:$0]  (!%p375_p0), %s130_s15, 128, %s132_s14, %s119_s16, %s580_s17, %s580_s17, %s581_s18  }
  0x1f   : > { %p139_p2 = scmp.lt.s32.totalorder %s576_s23, 3 }
  0x21   : > { %p140_p3 = pnand %p344_p1, %p139_p2 }
  0x22   : > { %s684_s19 = sand.u32 (!%p140_p3), 1, %s560_s0  }
  0x23   : > { %143 = sbr.rel (%p140_p3) target bundleno = 74 (0x4a), region = 24  ;;  %s345_s24 = sshll.u32 (!%p140_p3), %s684_s19, 3 }
  0x24   : > { %s146_s25 = scalar_lea.sflag (!%p140_p3), [#allocation6], %s684_s19  ;;  %s149_s27 = scalar_lea.vmem (!%p140_p3), [#allocation5], %s345_s24 }
  0x28   : > { %547 = dma.done.wait (%p657_p8), %s146_s25, 128  }
  0x29   : > { %549 = vsyncadd (%p657_p8), %s146_s25, 4294967168  ;;  %s169_s28 = sld [smem:[#allocation3]]  ;;  %v184_v0 = vld [vmem:[%s149_s27] sm:$0x3]  ;;  %v359_v2 = vld [vmem:[%s149_s27 + $0x2] sm:$0x3] }
  0x2a   : > { %s346_s29 = sld [smem:[#allocation3 + $0x1]]  ;;  %v360_v5 = vld [vmem:[%s149_s27 + $0x4] sm:$0x3]  ;;  %v361_v9 = vld [vmem:[%s149_s27 + $0x6] sm:$0x3]  ;;  %s368_s15 = smul.u32 6, %s684_s19 }
  0x2b   : > { %s347_s7 = sld [smem:[#allocation3 + $0x2]]  ;;  %s369_s25 = smul.u32 6, %s568_s1 }
  0x2c   : > { %s348_s8 = sld [smem:[#allocation3 + $0x3]]  ;;  %s168_s27 = scalar_lea.vmem [#allocation8], %s368_s15 }
  0x2d   : > { %s181_s9 = sld [smem:[#allocation4]]  ;;  %s249_s1 = sshll.u32 %s168_s27, 4  ;;  %s250_s1 = int_to_ptr.vmem [resolvable:$true] %s249_s1 }
  0x2e   : > { %s349_s10 = sld [smem:[#allocation3 + $0x80]] }
  0x2f   : > { %v185_v1 = vstv %s169_s28  ;;  %s350_s11 = sld [smem:[#allocation3 + $0x81]] }
  0x30   : > { %v186_v3 = vmul.f32 %v185_v1, %v184_v0  ;;  %v199_v4 = vstv %s346_s29  ;;  %s351_s12 = sld [smem:[#allocation3 + $0x82]] }
  0x31   : > { %v210_v6 = vstv %s347_s7  ;;  %v200_v7 = vmul.f32 %v359_v2, %v199_v4  ;;  %s692_s13 = sld [smem:[#allocation3 + $0x83]]  ;;  %s248_s7 = scalar_lea.hbm %s736_s3, %s369_s25 }
  0x32   : > { %v221_v10 = vstv %s348_s8  ;;  %s357_s30 = sld [smem:[#allocation4 + $0x1]]  ;;  %v211_v12 = vmul.f32 %v360_v5, %v210_v6  ;;  %s251_s8 = sshll.u32 %s248_s7, 4  ;;  %s252_s8 = int_to_ptr.hbm [resolvable:$true] %s251_s8 }
  0x33   : > { %v187_v8 = vstv %s181_s9  ;;  %s353_s14 = sld [smem:[#allocation3 + $0x100]]  ;;  %v222_v15 = vmul.f32 %v361_v9, %v221_v10  ;;  %s236_s9 = scalar_lea.sflag [#allocation7], %s684_s19 }
  0x34   : > { %v188_v11 = vadd.f32 %v187_v8, %v186_v3  ;;  %v189_v13 = vstv %s349_s10  ;;  %s354_s16 = sld [smem:[#allocation3 + $0x101]]  ;;  %s506_s10 = sshra.s32 %s252_s8, 4  ;;  %s507_s10 = int_to_ptr.hbm [resolvable:$true] %s506_s10 }
  0x35   : > { %v190_v16 = vmul.f32 %v189_v13, %v184_v0  ;;  %v202_v17 = vstv %s350_s11  ;;  %s355_s17 = sld [smem:[#allocation3 + $0x102]]  ;;  %s508_s11 = scalar_lea.hbm %s507_s10, 6 }
  0x36   : > { %v201_v14 = vadd.f32 %v200_v7, %v188_v11  ;;  %v213_v18 = vstv %s351_s12  ;;  %s356_s18 = sld [smem:[#allocation3 + $0x103]]  ;;  %v203_v20 = vmul.f32 %v359_v2, %v202_v17  ;;  %p509_p4 = scmp.ne.s32.totalorder %s507_s10, %s508_s11 }
  0x37   : > { %s358_s24 = sld [smem:[#allocation4 + $0x2]]  ;;  %v224_v22 = vstv %s692_s13  ;;  %v214_v25 = vmul.f32 %v360_v5, %v213_v18  ;;  %p513_p7 = scmp.lt.s32.totalorder %s507_s10, %s736_s3 }
  0x38   : > { %v212_v19 = vadd.f32 %v211_v12, %v201_v14  ;;  %v191_v21 = vstv %s357_s30  ;;  %v225_v30 = vmul.f32 %v361_v9, %v224_v22  ;;  %p510_p5 = pnand %p509_p4, %p661_p9  ;;  %s512_s30 = scalar_lea.hbm %s736_s3, 12 }
  0x39   : > { %v192_v24 = vadd.f32 %v191_v21, %v190_v16  ;;  %v193_v26 = vstv %s353_s14  ;;  %p514_p8 = scmp.lt.s32.totalorder %s512_s30, %s508_s11 }
  0x3a   : > { %v223_v23 = vadd.f32 %v222_v15, %v212_v19  ;;  %v194_v27 = vmul.f32 %v193_v26, %v184_v0  ;;  %v205_v28 = vstv %s354_s16  ;;  %p511_p6 = pneg %p510_p5 }
  0x3b   : > { %v204_v29 = vadd.f32 %v203_v20, %v192_v24  ;;  %v216_v31 = vstv %s355_s17  ;;  %v206_v32 = vmul.f32 %v359_v2, %v205_v28  ;;  %p515_p10 = por %p514_p8, %p513_p7 }
  0x3c   : > { %230 = vst [vmem:[%s168_s27] sm:$0x3] %v223_v23  ;;  %v227_v35 = vstv %s356_s18  ;;  %v217_v37 = vmul.f32 %v360_v5, %v216_v31 }
  0x3d   : > { %v215_v33 = vadd.f32 %v214_v25, %v204_v29  ;;  %v195_v34 = vstv %s358_s24  ;;  %v228_v40 = vmul.f32 %v361_v9, %v227_v35  ;;  %p516_p13 = pnand %p515_p10, %p511_p6 }
  0x3e   : > { %v196_v36 = vadd.f32 %v195_v34, %v194_v27 }
  0x3f   : > { %v226_v38 = vadd.f32 %v225_v30, %v215_v33 }
  0x40   : > { %v207_v39 = vadd.f32 %v206_v32, %v196_v36 }
  0x41   : > { %362 = vst [vmem:[%s168_s27 + $0x2] sm:$0x3] %v226_v38 }
  0x42   : > { %v218_v41 = vadd.f32 %v217_v37, %v207_v39 }
  0x44   : > { %v229_v42 = vadd.f32 %v228_v40, %v218_v41 }
  0x46   : > { %363 = vst [vmem:[%s168_s27 + $0x4] sm:$0x3] %v229_v42 }
  0x47   : > { %519 = shalt.err (!%p516_p13)
}
  0x48   : > { %s582_s19 = smov 32   ;;  %s583_s16 = smov 2  }
  0x49   : > { %372 = dma.vmem_to_hbm [thread:$0]  (%p661_p9), %s250_s1, 96, %s252_s8, %s236_s9, %s582_s19, %s582_s19, %s583_s16  }
  0x4a PF: > { %s266_s17 = sand.u32 1, %s556_s20   ;;  %p379_p0 = pnand %p340_p12, %p668_p11 }
  0x4b   : > { %s267_s18 = scalar_lea.sflag [#allocation7], %s266_s17 }
  0x4c   : > { %p380_p1 = pneg %p379_p0 }
  0x4e   : > { %551 = dma.done.wait (%p380_p1), %s267_s18, 96  }
  0x4f   : > { %553 = vsyncadd (%p380_p1), %s267_s18, 4294967200  ;;  %s32_s23 = sadd.s32 1, %s576_s23   ;;  %s742_s20 = smov %s560_s0 }
  0x50   : > { %p29_p2 = scmp.ge.s32.totalorder %s32_s23, 4   ;;  %s743_s0 = smov %s564_s21 }
  0x51   : > { %s744_s21 = smov %s666_s5  ;;  %s745_s1 = smov %s572_s22 }
  0x52   : > { %s746_s22 = smov %s748_s26  ;;  %31 = sbr.rel (!%p29_p2) target bundleno = 13 (0xd), region = 74 }
  0x57   :  { %273 = vsyncpa [#allocation6], 1 }
  0x58   :  { %275 = vsyncpa [#allocation6 + $0x1], 1 }
  0x59   :  { %276 = vsyncpa [#allocation7], 1 }
  0x5a   :  { %278 = vsyncpa [#allocation7 + $0x1], 1 }

</bundles_post_ra>
